<compile_context>
chip_gen: v7x
topology: tpu7x:2x2x1
jax: 0.10.0
libtpu: 0.0.40
codegen_flags: <defaults>
</compile_context>

<pallas_src>
import math

import jax
import jax.numpy as jnp
import numpy as np
from jax.experimental import pallas as pl
from jax.experimental.pallas import tpu as pltpu


# ----------------------------------------------------------------------------
# Kernel: fused QKV projection with in-kernel split into (q, kv)
# ----------------------------------------------------------------------------
def _qkv_kernel(x_ref, wq_ref, wkv_ref, bq_ref, bkv_ref, q_ref, kv_ref):
    # x_ref  : (TM, dim)          VMEM (per-step tile)
    # wq_ref : (dim, qk_dim)      VMEM (resident across grid steps)
    # wkv_ref: (dim, qk_dim+dim)  VMEM (resident across grid steps)
    # bq_ref : (1, qk_dim)        VMEM
    # bkv_ref: (1, qk_dim+dim)    VMEM
    x = x_ref[...]
    q = jnp.dot(x, wq_ref[...], preferred_element_type=jnp.float32) + bq_ref[...]
    kv = jnp.dot(x, wkv_ref[...], preferred_element_type=jnp.float32) + bkv_ref[...]
    q_ref[...] = q.astype(q_ref.dtype)
    kv_ref[...] = kv.astype(kv_ref.dtype)


def _pick_tile_m(m, dim, qk_dim, kv_dim, itemsize, vmem_budget=24 * 1024 * 1024):
    """Largest row tile (multiple of 128, <=1024) whose double-buffered
    x / q / kv tiles plus the resident weights fit in the VMEM budget."""
    out_w = qk_dim + kv_dim
    w_bytes = (dim * out_w + out_w) * itemsize          # resident weights + bias
    per_row = (dim + qk_dim + kv_dim) * itemsize * 2    # double-buffered tiles
    avail = max(vmem_budget - 2 * w_bytes, per_row * 128)
    tile = int(min(1024, avail // per_row))
    tile = max(128, (tile // 128) * 128)
    if m <= tile:
        return m                                        # single full block, no padding
    return tile


def qkv_linear(x, weight, bias, qk_dim):
    """Pallas QKVLinear forward.

    x      : (..., dim)
    weight : (2*qk_dim + dim, dim)   -- PyTorch nn.Linear layout
    bias   : (2*qk_dim + dim,)
    returns (q: (..., qk_dim), kv: (..., qk_dim + dim))
    """
    out_dtype = x.dtype
    *lead, dim = x.shape
    out_dim = weight.shape[0]
    kv_dim = out_dim - qk_dim

    m = 1
    for d in lead:
        m *= int(d)
    x2 = x.reshape(m, dim)

    tile_m = _pick_tile_m(m, dim, qk_dim, kv_dim, jnp.dtype(out_dtype).itemsize)
    m_pad = pl.cdiv(m, tile_m) * tile_m
    if m_pad != m:
        x2 = jnp.pad(x2, ((0, m_pad - m), (0, 0)))

    # One-time weight transpose + column split: the q/kv split lives here, so the
    # kernel writes q and kv directly instead of slicing a fused output.
    wt = weight.T                               # (dim, out_dim)
    wq = wt[:, :qk_dim]                         # (dim, qk_dim)
    wkv = wt[:, qk_dim:]                        # (dim, qk_dim + dim)
    bq = bias[:qk_dim].reshape(1, qk_dim)
    bkv = bias[qk_dim:].reshape(1, kv_dim)

    q, kv = pl.pallas_call(
        _qkv_kernel,
        out_shape=(
            jax.ShapeDtypeStruct((m_pad, qk_dim), out_dtype),
            jax.ShapeDtypeStruct((m_pad, kv_dim), out_dtype),
        ),
        grid=(m_pad // tile_m,),
        in_specs=[
            pl.BlockSpec((tile_m, dim), lambda i: (i, 0)),
            pl.BlockSpec((dim, qk_dim), lambda i: (0, 0)),
            pl.BlockSpec((dim, kv_dim), lambda i: (0, 0)),
            pl.BlockSpec((1, qk_dim), lambda i: (0, 0)),
            pl.BlockSpec((1, kv_dim), lambda i: (0, 0)),
        ],
        out_specs=(
            pl.BlockSpec((tile_m, qk_dim), lambda i: (i, 0)),
            pl.BlockSpec((tile_m, kv_dim), lambda i: (i, 0)),
        ),
        compiler_params=pltpu.CompilerParams(
            dimension_semantics=("parallel",),
        ),
    )(x2, wq, wkv, bq, bkv)

    if m_pad != m:
        q = q[:m]
        kv = kv[:m]
    return q.reshape(*lead, qk_dim), kv.reshape(*lead, kv_dim)


# ----------------------------------------------------------------------------
# Deterministic parameter init (matches nn.Linear(dim, 2*qk_dim + dim, bias=True))
# ----------------------------------------------------------------------------
def init_params(key, dim, qk_dim):
    out_dim = 2 * qk_dim + dim
    kw, kb = jax.random.split(key)
    bound = 1.0 / math.sqrt(dim)                # PyTorch default init range
    return {
        "weight": jax.random.uniform(kw, (out_dim, dim), jnp.float32, -bound, bound),
        "bias": jax.random.uniform(kb, (out_dim,), jnp.float32, -bound, bound),
    }


# ----------------------------------------------------------------------------
# Pure-JAX reference for correctness check
# ----------------------------------------------------------------------------
def reference_forward(x, params, qk_dim):
    y = jnp.einsum("...d,od->...o", x, params["weight"]) + params["bias"]
    return y[..., :qk_dim], y[..., qk_dim:]


def _check(x, params, qk_dim):
    fwd = jax.jit(lambda x, p: qkv_linear(x, p["weight"], p["bias"], qk_dim))
    q, kv = jax.block_until_ready(fwd(x, params))
    q_ref, kv_ref = reference_forward(x, params, qk_dim)
    np.testing.assert_allclose(np.asarray(q), np.asarray(q_ref), rtol=1e-5, atol=1e-5)
    np.testing.assert_allclose(np.asarray(kv), np.asarray(kv_ref), rtol=1e-5, atol=1e-5)
    return q, kv


if __name__ == "__main__":
    key = jax.random.PRNGKey(0)
    kx, kp, kx2, kp2 = jax.random.split(key, 4)

    # Small case: single full block, no padding.
    B, S, DIM, QK_DIM = 2, 8, 32, 16            # x: (batch, seq, dim)
    x = jax.random.normal(kx, (B, S, DIM), jnp.float32)
    params = init_params(kp, DIM, QK_DIM)
    q, kv = _check(x, params, QK_DIM)
    assert q.shape == (B, S, QK_DIM) and kv.shape == (B, S, QK_DIM + DIM)

    # Larger case: exercises multi-step row tiling + tail padding.
    B2, S2, DIM2, QK2 = 3, 400, 64, 32          # M = 1200 rows
    x2 = jax.random.normal(kx2, (B2, S2, DIM2), jnp.float32)
    params2 = init_params(kp2, DIM2, QK2)
    q2, kv2 = _check(x2, params2, QK2)
    assert q2.shape == (B2, S2, QK2) and kv2.shape == (B2, S2, QK2 + DIM2)

    print("KERNEL_OK")
</pallas_src>

<mosaic_0001>
module attributes {stable_mosaic.version = 11 : i64} {
  func.func @_qkv_kernel(%arg0: i32, %arg1: memref<16x32xf32, #tpu.memory_space<vmem>>, %arg2: memref<32x16xf32, #tpu.memory_space<vmem>>, %arg3: memref<32x48xf32, #tpu.memory_space<vmem>>, %arg4: memref<1x16xf32, #tpu.memory_space<vmem>>, %arg5: memref<1x48xf32, #tpu.memory_space<vmem>>, %arg6: memref<16x16xf32, #tpu.memory_space<vmem>>, %arg7: memref<16x48xf32, #tpu.memory_space<vmem>>) attributes {dimension_semantics = [#tpu.dimension_semantics<parallel>], iteration_bounds = array<i64: 1>, scalar_prefetch = 0 : i64, scratch_operands = 0 : i64, tpu.core_type = #tpu.core_type<tc>, window_params = [{transform_indices = @transform_0, window_bounds = array<i64: 16, 32>}, {pipeline_mode = #tpu.pipeline_mode<synchronous>, transform_indices = @transform_1, window_bounds = array<i64: 32, 16>}, {pipeline_mode = #tpu.pipeline_mode<synchronous>, transform_indices = @transform_2, window_bounds = array<i64: 32, 48>}, {pipeline_mode = #tpu.pipeline_mode<synchronous>, transform_indices = @transform_3, window_bounds = array<i64: 1, 16>}, {pipeline_mode = #tpu.pipeline_mode<synchronous>, transform_indices = @transform_4, window_bounds = array<i64: 1, 48>}, {transform_indices = @transform_5, window_bounds = array<i64: 16, 16>}, {transform_indices = @transform_6, window_bounds = array<i64: 16, 48>}]} {
    %c0 = arith.constant 0 : index
    %c0_0 = arith.constant 0 : index
    %0 = vector.load %arg1[%c0, %c0_0] : memref<16x32xf32, #tpu.memory_space<vmem>>, vector<16x32xf32>
    %c0_1 = arith.constant 0 : index
    %c0_2 = arith.constant 0 : index
    %1 = vector.load %arg2[%c0_1, %c0_2] : memref<32x16xf32, #tpu.memory_space<vmem>>, vector<32x16xf32>
    %cst = arith.constant dense<0.000000e+00> : vector<16x16xf32>
    %2 = tpu.matmul %0, %1, %cst {dimension_numbers = #tpu.dot_dimension_numbers<[1], [0], [0], [1], [0, 0, 1, 1], [], []>} : vector<16x32xf32>, vector<32x16xf32>, vector<16x16xf32> -> vector<16x16xf32>
    %c0_3 = arith.constant 0 : index
    %c0_4 = arith.constant 0 : index
    %3 = vector.load %arg4[%c0_3, %c0_4] : memref<1x16xf32, #tpu.memory_space<vmem>>, vector<1x16xf32>
    %4 = vector.broadcast %3 : vector<1x16xf32> to vector<16x16xf32>
    %5 = arith.addf %2, %4 : vector<16x16xf32>
    %c0_5 = arith.constant 0 : index
    %c0_6 = arith.constant 0 : index
    %6 = vector.load %arg3[%c0_5, %c0_6] : memref<32x48xf32, #tpu.memory_space<vmem>>, vector<32x48xf32>
    %cst_7 = arith.constant dense<0.000000e+00> : vector<16x48xf32>
    %7 = tpu.matmul %0, %6, %cst_7 {dimension_numbers = #tpu.dot_dimension_numbers<[1], [0], [0], [1], [0, 0, 1, 1], [], []>} : vector<16x32xf32>, vector<32x48xf32>, vector<16x48xf32> -> vector<16x48xf32>
    %c0_8 = arith.constant 0 : index
    %c0_9 = arith.constant 0 : index
    %8 = vector.load %arg5[%c0_8, %c0_9] : memref<1x48xf32, #tpu.memory_space<vmem>>, vector<1x48xf32>
    %9 = vector.broadcast %8 : vector<1x48xf32> to vector<16x48xf32>
    %10 = arith.addf %7, %9 : vector<16x48xf32>
    %c0_10 = arith.constant 0 : index
    %c0_11 = arith.constant 0 : index
    %11 = vector.load %arg6[%c0_10, %c0_11] : memref<16x16xf32, #tpu.memory_space<vmem>>, vector<16x16xf32>
    tpu.vector_store %arg6[%c0_10, %c0_11], %5 {strides = array<i32>} : memref<16x16xf32, #tpu.memory_space<vmem>>, vector<16x16xf32>,
    %c0_12 = arith.constant 0 : index
    %c0_13 = arith.constant 0 : index
    %12 = vector.load %arg7[%c0_12, %c0_13] : memref<16x48xf32, #tpu.memory_space<vmem>>, vector<16x48xf32>
    tpu.vector_store %arg7[%c0_12, %c0_13], %10 {strides = array<i32>} : memref<16x48xf32, #tpu.memory_space<vmem>>, vector<16x48xf32>,
    return
  }
  func.func @transform_0(%arg0: i32) -> (i32, i32) {
    %c0_i32 = arith.constant 0 : i32
    %c0_i32_0 = arith.constant 0 : i32
    return %arg0, %c0_i32 : i32, i32
  }
  func.func @transform_1(%arg0: i32) -> (i32, i32) {
    %c0_i32 = arith.constant 0 : i32
    %c0_i32_0 = arith.constant 0 : i32
    %c0_i32_1 = arith.constant 0 : i32
    return %c0_i32, %c0_i32_0 : i32, i32
  }
  func.func @transform_2(%arg0: i32) -> (i32, i32) {
    %c0_i32 = arith.constant 0 : i32
    %c0_i32_0 = arith.constant 0 : i32
    %c0_i32_1 = arith.constant 0 : i32
    return %c0_i32, %c0_i32_0 : i32, i32
  }
  func.func @transform_3(%arg0: i32) -> (i32, i32) {
    %c0_i32 = arith.constant 0 : i32
    %c0_i32_0 = arith.constant 0 : i32
    %c0_i32_1 = arith.constant 0 : i32
    return %c0_i32, %c0_i32_0 : i32, i32
  }
  func.func @transform_4(%arg0: i32) -> (i32, i32) {
    %c0_i32 = arith.constant 0 : i32
    %c0_i32_0 = arith.constant 0 : i32
    %c0_i32_1 = arith.constant 0 : i32
    return %c0_i32, %c0_i32_0 : i32, i32
  }
  func.func @transform_5(%arg0: i32) -> (i32, i32) {
    %c0_i32 = arith.constant 0 : i32
    %c0_i32_0 = arith.constant 0 : i32
    return %arg0, %c0_i32 : i32, i32
  }
  func.func @transform_6(%arg0: i32) -> (i32, i32) {
    %c0_i32 = arith.constant 0 : i32
    %c0_i32_0 = arith.constant 0 : i32
    return %arg0, %c0_i32 : i32, i32
  }
}

</mosaic_0001>

<bundles_post_ra>
// kernel: _lambda_.1
= control target key start
LH: loop header
LB: loop body
LE: loop exit
PB: predicated region body
PF: predicated region fallthrough
CT: control target
= control target key end

     0   :  { %12 = vsyncpa [#allocation3], 0  ;;  %vm37_vm0 = vcmask 261120   ;;  %s461_s0 = inlined_call_operand.vmem [shape: f32[16,32], index: 0, kind: input, shape index: {}]   ;;  %s462_s1 = inlined_call_operand.vmem [shape: f32[32,16], index: 1, kind: input, shape index: {}]   ;;  %s463_s2 = inlined_call_operand.vmem [shape: f32[32,48], index: 2, kind: input, shape index: {}]   ;;  %s464_s3 = inlined_call_operand.vmem [shape: f32[1,16], index: 3, kind: input, shape index: {}]   ;;  %s465_s4 = inlined_call_operand.vmem [shape: f32[1,48], index: 4, kind: input, shape index: {}]   ;;  %s466_s5 = inlined_call_operand.hbm [shape: f32[16,16], index: 5, kind: output, shape index: {0}]   ;;  %s467_s6 = inlined_call_operand.hbm [shape: f32[16,48], index: 6, kind: output, shape index: {1}]  }
   0x1   :  { %v26_v0 = vld [vmem:[%s462_s1] sm:$0xff]  ;;  %v27_v1 = vld [vmem:[%s462_s1 + $0x8] sm:$0xff]  ;;  %v28_v5 = vld [vmem:[%s462_s1 + $0x10] sm:$0xff] }
   0x2   :  { %v119_v2 = vld [vmem:[%s463_s2] sm:$0xff]  ;;  %v283_v3 = vpack.c.bf16 %v27_v1, %v26_v0  ;;  %v120_v4 = vld [vmem:[%s463_s2 + $0x8] sm:$0xff]  ;;  %v29_v6 = vld [vmem:[%s462_s1 + $0x18] sm:$0xff] }
   0x3   :  { %v291_v7 = vpack.c.bf16 %v120_v4, %v119_v2  ;;  %v287_v8 = vpack.c.bf16 %v29_v6, %v28_v5  ;;  %v121_v9 = vld [vmem:[%s463_s2 + $0x10] sm:$0xff]  ;;  %v122_v10 = vld [vmem:[%s463_s2 + $0x18] sm:$0xff]  ;;  %v24_v11 = vld [vmem:[%s461_s0] sm:$0xff] }
   0x4   :  { %284 = vmatprep.subr.bf16.mxu0 %v283_v3  ;;  %v295_v12 = vpack.c.bf16 %v122_v10, %v121_v9  ;;  %269 = vmatprep.mubr.msk.f32.mxu0 %vm37_vm0, %v24_v11 }
   0x5   :  { %13 = vsyncpa [#allocation5], 0  ;;  %292 = vmatprep.subr.bf16.mxu1 %v291_v7  ;;  %286 = vmatpush3.bf16.msra.mxu0 %v283_v3  ;;  %v25_v13 = vld [vmem:[%s461_s0 + $0x8] sm:$0xff]  ;;  %v243_v14 = vld [vmem:[%s464_s3] ss:$0 sm:$0xff]  ;;  %s351_s17 = smov [#allocation2]  }
   0x6   :  { %294 = vmatpush3.bf16.msra.mxu1 %v291_v7  ;;  %288 = vmatprep.subr.bf16.mxu0 %v287_v8  ;;  %s216_s18 = sshll.u32 %s351_s17, 4  ;;  %v246_v15 = vld [vmem:[%s465_s4] ss:$0 sm:$0xff]  ;;  %vm205_vm1 = vcmask 130048   ;;  %s352_s21 = smov [#allocation4]   ;;  %vm208_vm2 = vcmask 392192   ;;  %s217_s18 = int_to_ptr.vmem [resolvable:$true] %s216_s18 }
   0x7   :  { %296 = vmatprep.subr.bf16.mxu1 %v295_v12  ;;  %280 = vmatprep.mubr.msk.f32.mxu1 %vm37_vm0, %v24_v11  ;;  %s228_s22 = sshll.u32 %s352_s21, 4  ;;  %s303_s0 = scalar_lea.vmem %s217_s18, 256  ;;  %s430_s22 = int_to_ptr.vmem [resolvable:$true] %s228_s22 }
   0x8   :  { %p304_p0 = scmp.ne.s32.totalorder %s217_s18, %s303_s0  ;;  %p308_p1 = scmp.lt.s32.totalorder %s217_s18, %s217_s18 }
   0x9   :  { %290 = vmatpush3.bf16.msra.mxu0 %v287_v8  ;;  %p309_p2 = scmp.lt.s32.totalorder %s303_s0, %s303_s0 }
   0xa   :  { %298 = vmatpush3.bf16.msra.mxu1 %v295_v12 }
   0xb   :  { %p310_p3 = por %p309_p2, %p308_p1 }
   0xc   :  { %270 = vmatmul.mubr.msk.f32.vlgmr.msra.gmra.mrb[0].mxu0 %vm37_vm0, %v25_v13 }
   0xd   :  { %281 = vmatmul.mubr.msk.f32.vlgmr.msra.gmra.mrb[0].mxu1 %vm37_vm0, %v25_v13  ;;  %p311_p4 = pnand %p310_p3, %p304_p0 }
  0xdf   :  { %v271_v16 = vpop.f32.mrb[0].mxu0 }
  0xe0   :  { %v116_v17 = vadd.f32 %v271_v16, %v243_v14  ;;  %v282_v18 = vpop.f32.mrb[0].mxu1  ;;  %v110_v19 = vpop.f32.mrb[1].mxu0 }
  0xe1   :  { %v202_v20 = vadd.f32 %v282_v18, %v246_v15  ;;  %v111_v21 = vadd.f32 %v243_v14, %v110_v19  ;;  %v196_v22 = vpop.f32.mrb[1].mxu1 }
  0xe2   :  { %207 = vst.msk [vmem:[#allocation2 + $0x8] sm:$0xff] %vm205_vm1, %v116_v17  ;;  %v197_v23 = vadd.f32 %v246_v15, %v196_v22 }
  0xe3   :  { %210 = vst.msk [vmem:[#allocation4 + $0x8] sm:$0xff] %vm208_vm2, %v202_v20 }
  0xe4   :  { %206 = vst.msk [vmem:[#allocation2] sm:$0xff] %vm205_vm1, %v111_v21 }
  0xe5   :  { %209 = vst.msk [vmem:[#allocation4] sm:$0xff] %vm208_vm2, %v197_v23 }
  0xe6   :  { %314 = shalt.err (!%p311_p4)
}
  0xe7   :  { %s315_s23 = scalar_lea.hbm %s466_s5, 256 }
  0xe8   :  { %p316_p5 = scmp.ne.s32.totalorder %s466_s5, %s315_s23  ;;  %p319_p6 = scmp.lt.u32.totalorder %s315_s23, %s466_s5 }
  0xea   :  { %p321_p7 = pnand %p319_p6, %p316_p5 }
  0xec   :  { %324 = shalt.err (!%p321_p7)
}
  0xed   :  { %s353_s28 = smov 128   ;;  %s354_s29 = smov 8  }
  0xee   :  { %222 = dma.vmem_to_hbm [thread:$0]  %s217_s18, 256, %s466_s5, [#allocation3], %s353_s28, %s353_s28, %s354_s29  }
  0xef   :  { %s325_s8 = scalar_lea.vmem %s430_s22, 256  ;;  %p330_p9 = scmp.lt.s32.totalorder %s430_s22, %s430_s22 }
  0xf0   :  { %p326_p8 = scmp.ne.s32.totalorder %s430_s22, %s325_s8  ;;  %p331_p10 = scmp.lt.s32.totalorder %s325_s8, %s325_s8 }
  0xf2   :  { %p332_p11 = por %p331_p10, %p330_p9 }
  0xf4   :  { %p333_p12 = pnand %p332_p11, %p326_p8 }
  0xf6   :  { %336 = shalt.err (!%p333_p12)
}
  0xf7   :  { %s337_s11 = scalar_lea.hbm %s467_s6, 256 }
  0xf8   :  { %p338_p13 = scmp.ne.s32.totalorder %s467_s6, %s337_s11  ;;  %p341_p0 = scmp.lt.u32.totalorder %s337_s11, %s467_s6 }
  0xfa   :  { %p343_p1 = pnand %p341_p0, %p338_p13 }
  0xfc   :  { %346 = shalt.err (!%p343_p1)
}
  0xfd   :  { %234 = dma.vmem_to_hbm [thread:$0]  %s430_s22, 256, %s467_s6, [#allocation5], %s353_s28, %s353_s28, %s354_s29  }
  0xfe   :  { %347 = dma.done.wait [#allocation3], 256  }
  0xff   :  { %348 = vsyncadd [#allocation3], 4294967040 }
 0x100   :  { %349 = dma.done.wait [#allocation5], 256  }
 0x101   :  { %350 = vsyncadd [#allocation5], 4294967040 }
 0x102   :  { %241 = vsyncpa [#allocation3], 1 }
 0x103   :  { %242 = vsyncpa [#allocation5], 1 }

</bundles_post_ra>
